<compile_context>
chip_gen: v7x
topology: tpu7x:2x2x1
jax: 0.10.0
libtpu: 0.0.40
codegen_flags: <defaults>
</compile_context>

<pallas_src>
from functools import partial

import jax
import jax.numpy as jnp
from jax.experimental import pallas as pl
from jax.experimental.pallas import tpu as pltpu


# --------------------------------------------------------------------------- #
# Kernel
# --------------------------------------------------------------------------- #
def _mmoe_kernel(x_ref, w_ref, aux_ref, out_ref, *, F, E, T, U, EH, TH):
    # Static geometry / slab row offsets (all multiples of 8 for these configs).
    C1 = E * EH + T * E          # fused fc1+gate output width
    TE = T * E
    TEU = T * E * U              # tiled expert-output width (= tower-fc1 input width)
    TTH = T * TH
    r2 = F                       # w slab rows: [0,r2)=W1, [r2,r3)=W2t, [r3,r4)=W3e, [r4,r5)=W4
    r3 = r2 + E * EH
    r4 = r3 + TEU
    r5 = r4 + TTH

    x = x_ref[...]                                     # [B, F]  (compute dtype)
    wdt = w_ref.dtype

    # ---- experts fc1 + all gate logits in ONE MXU push: [B, C1] ----
    z1 = jnp.dot(x, w_ref[0:r2, 0:C1],
                 preferred_element_type=jnp.float32) + aux_ref[0:1, 0:C1]
    h = jnp.maximum(z1[:, 0:E * EH], 0.0)              # [B, E*EH] (slice at 128-lane boundary)
    gl = z1[:, E * EH:C1]                              # [B, T*E]  gate logits

    # ---- experts fc2 (block-diag, columns pre-tiled T times): [B, TEU] ----
    eo = jnp.dot(h.astype(wdt), w_ref[r2:r3, 0:TEU],
                 preferred_element_type=jnp.float32) + aux_ref[1:2, 0:TEU]

    # ---- per-task softmax, fully vectorized ----
    # Subtracting the row-global max keeps every per-task softmax mathematically
    # identical (constant shift within each segment) and numerically safe for
    # realistic logit ranges.
    m = jnp.max(gl, axis=1, keepdims=True)             # one tiny cross-lane reduce
    ex = jnp.exp(gl - m)                               # [B, T*E], f32
    # One 0/1 matmul produces BOTH the U-repeated numerators and the per-task
    # denominators broadcast to [B, TEU]; the 128-lane slice boundary is free.
    gm = jnp.dot(ex, aux_ref[4:4 + TE, 0:2 * TEU],
                 preferred_element_type=jnp.float32)   # [B, 2*TEU]
    gate_rep = gm[:, 0:TEU] / gm[:, TEU:2 * TEU]       # exact normalization

    # ---- gate-weighted expert mixture; the sum over experts is folded into the
    #      tower-fc1 weight (rows repeated E times), i.e. done on the MXU. ----
    prod = gate_rep * eo                               # [B, TEU]

    th = jnp.dot(prod.astype(wdt), w_ref[r3:r4, 0:TTH],
                 preferred_element_type=jnp.float32) + aux_ref[2:3, 0:TTH]
    th = jnp.maximum(th, 0.0)                          # [B, T*TH]

    ty = jnp.dot(th.astype(wdt), w_ref[r4:r5, 0:T],
                 preferred_element_type=jnp.float32) + aux_ref[3:4, 0:T]
    out_ref[...] = jax.nn.sigmoid(ty)                  # [B, T]


# --------------------------------------------------------------------------- #
# One-time parameter packing (NOT on the per-call forward path)
# --------------------------------------------------------------------------- #
def prepare_params(p, compute_dtype=jnp.float32):
    """Pack PyTorch-layout ([out, in]) stacked weights into two kernel slabs.

    Returns:
      w    : [F + E*EH + T*E*U + T*TH, max_width] compute-dtype weight slab
             (W1 fused fc1+gates | W2 tiled block-diag | W3 expert-expanded
              block-diag tower fc1 | W4 block-diag tower fc2).
      aux  : [4 + T*E, 2*T*E*U] float32 slab (4 bias rows + gate repeat/denominator
             0-1 matrices).
    """
    E, EH, F = p["ew1"].shape
    U = p["ew2"].shape[1]
    T, TH = p["tw1"].shape[0], p["tw1"].shape[1]
    C1 = E * EH + T * E
    TE = T * E
    TEU = T * E * U
    TTH = T * TH

    # --- W1: fused expert fc1 + gate weights  [F, C1] ---
    w1 = jnp.zeros((F, C1), jnp.float32)
    w1 = w1.at[:, :E * EH].set(jnp.transpose(p["ew1"], (2, 0, 1)).reshape(F, E * EH))
    w1 = w1.at[:, E * EH:].set(jnp.transpose(p["gw"], (2, 0, 1)).reshape(F, TE))
    b1 = jnp.concatenate([p["eb1"].reshape(-1), p["gb"].reshape(-1)])          # [C1]

    # --- W2t: expert fc2 block-diag, columns tiled T times  [E*EH, TEU] ---
    w2 = jnp.zeros((E * EH, E * U), jnp.float32)
    for e in range(E):
        w2 = w2.at[e * EH:(e + 1) * EH, e * U:(e + 1) * U].set(p["ew2"][e].T)
    w2t = jnp.tile(w2, (1, T))                                                 # [E*EH, TEU]
    b2t = jnp.tile(p["eb2"].reshape(-1), (T,))                                 # [TEU]

    # --- G: gate repeat (R) + per-task denominator broadcast (D)  [TE, 2*TEU] ---
    col = jnp.arange(TEU)
    row = jnp.arange(TE)
    R = (col[None, :] // U == row[:, None]).astype(jnp.float32)
    D = (col[None, :] // (E * U) == row[:, None] // E).astype(jnp.float32)
    G = jnp.concatenate([R, D], axis=1)                                        # [TE, 2*TEU]

    # --- W3e: tower fc1, rows repeated E times (absorbs the expert-sum), block-diag
    #          over tasks  [TEU, TTH] ---
    w3 = jnp.zeros((TEU, TTH), jnp.float32)
    for t in range(T):
        blk = jnp.tile(p["tw1"][t].T, (E, 1))                                  # [E*U, TH]
        w3 = w3.at[t * E * U:(t + 1) * E * U, t * TH:(t + 1) * TH].set(blk)
    b3 = p["tb1"].reshape(-1)                                                  # [TTH]

    # --- W4: tower fc2 block-diag  [TTH, T] ---
    w4 = jnp.zeros((TTH, T), jnp.float32)
    for t in range(T):
        w4 = w4.at[t * TH:(t + 1) * TH, t].set(p["tw2"][t][0])
    b4 = p["tb2"].reshape(-1)                                                  # [T]

    # --- consolidate: ONE compute-dtype weight slab + ONE f32 aux slab ---
    wlanes = max(C1, TEU, TTH, T)
    def padw(w):
        return jnp.pad(w, ((0, 0), (0, wlanes - w.shape[1])))
    w_slab = jnp.concatenate([padw(w1), padw(w2t), padw(w3), padw(w4)], axis=0)

    alanes = 2 * TEU
    def padrow(v):
        v = v.reshape(1, -1)
        return jnp.pad(v, ((0, 0), (0, alanes - v.shape[1])))
    aux = jnp.concatenate(
        [padrow(b1), padrow(b2t), padrow(b3), padrow(b4),
         jnp.pad(G, ((0, 0), (0, alanes - G.shape[1])))], axis=0)

    return {
        "w": w_slab.astype(compute_dtype),
        "aux": aux.astype(jnp.float32),
        "dims": (F, E, T, U, EH, TH),
        "compute_dtype": compute_dtype,
    }


# --------------------------------------------------------------------------- #
# Forward
# --------------------------------------------------------------------------- #
def mmoe_forward(x, packed):
    """x: [B, F] float32.  Returns [T, B, 1] (torch: list of per-task [B, 1])."""
    F, E, T, U, EH, TH = packed["dims"]
    B = x.shape[0]
    xc = x.astype(packed["compute_dtype"])

    out_bt = pl.pallas_call(
        partial(_mmoe_kernel, F=F, E=E, T=T, U=U, EH=EH, TH=TH),
        out_shape=jax.ShapeDtypeStruct((B, T), jnp.float32),
        in_specs=[pl.BlockSpec(memory_space=pltpu.VMEM)] * 3,
        out_specs=pl.BlockSpec(memory_space=pltpu.VMEM),
    )(xc, packed["w"], packed["aux"])

    # [B, T] kernel output -> [T, B, 1] to match the torch module.
    # TODO(synk): at serving batch sizes, store lane-dense [T, B] from the kernel
    # instead and drop this transpose.
    return jnp.transpose(out_bt)[:, :, None]


# --------------------------------------------------------------------------- #
# Raw (PyTorch-layout) parameter init + pure-JAX reference
# --------------------------------------------------------------------------- #
def init_params(key, F, E, T, U, EH, TH):
    ks = jax.random.split(key, 11)
    s = 0.1
    return {
        "ew1": s * jax.random.normal(ks[0], (E, EH, F), jnp.float32),
        "eb1": s * jax.random.normal(ks[1], (E, EH), jnp.float32),
        "ew2": s * jax.random.normal(ks[2], (E, U, EH), jnp.float32),
        "eb2": s * jax.random.normal(ks[3], (E, U), jnp.float32),
        "gw":  s * jax.random.normal(ks[4], (T, E, F), jnp.float32),
        "gb":  s * jax.random.normal(ks[5], (T, E), jnp.float32),
        "tw1": s * jax.random.normal(ks[6], (T, TH, U), jnp.float32),
        "tb1": s * jax.random.normal(ks[7], (T, TH), jnp.float32),
        "tw2": s * jax.random.normal(ks[8], (T, 1, TH), jnp.float32),
        "tb2": s * jax.random.normal(ks[9], (T, 1), jnp.float32),
    }


def mmoe_reference(x, p):
    """Pure-JAX reference mirroring the PyTorch forward."""
    E = p["ew1"].shape[0]
    T = p["gw"].shape[0]
    experts = []
    for e in range(E):
        h = jnp.maximum(x @ p["ew1"][e].T + p["eb1"][e], 0.0)
        experts.append(h @ p["ew2"][e].T + p["eb2"][e])
    experts_o = jnp.stack(experts)                                     # [E, B, U]
    outs = []
    for t in range(T):
        g = jax.nn.softmax(x @ p["gw"][t].T + p["gb"][t], axis=1)      # [B, E]
        ti = jnp.sum(g.T[:, :, None] * experts_o, axis=0)              # [B, U]
        th = jnp.maximum(ti @ p["tw1"][t].T + p["tb1"][t], 0.0)
        outs.append(jax.nn.sigmoid(th @ p["tw2"][t].T + p["tb2"][t]))  # [B, 1]
    return jnp.stack(outs)                                             # [T, B, 1]


if __name__ == "__main__":
    # config: num_feature=32, num_experts=4, num_tasks=2 (== len(label_dict)),
    # units=16, expert_hidden=32, hidden_units=16
    B, F, E, T, U, EH, TH = 8, 32, 4, 2, 16, 32, 16

    key = jax.random.PRNGKey(0)
    kx, kp = jax.random.split(key)
    x = jax.random.normal(kx, (B, F), jnp.float32)
    params = init_params(kp, F, E, T, U, EH, TH)
    ref = mmoe_reference(x, params)

    # --- f32 compute path (tight tolerance) ---
    packed_f32 = prepare_params(params, compute_dtype=jnp.float32)
    out_f32 = jax.block_until_ready(mmoe_forward(x, packed_f32))
    assert out_f32.shape == (T, B, 1)
    assert jnp.allclose(out_f32, ref, atol=1e-3, rtol=1e-3), "f32 mismatch vs reference"

    # --- bf16 matmul-operand path (MXU-native on v5e/v6e/v7x), looser tolerance ---
    packed_bf16 = prepare_params(params, compute_dtype=jnp.bfloat16)
    out_bf16 = jax.block_until_ready(mmoe_forward(x, packed_bf16))
    assert out_bf16.shape == (T, B, 1)
    assert jnp.allclose(out_bf16, ref, atol=5e-2, rtol=5e-2), "bf16 mismatch vs reference"

    print("KERNEL_OK")
</pallas_src>

<mosaic_0001>
module attributes {stable_mosaic.version = 11 : i64} {
  func.func @_mmoe_kernel(%arg0: memref<8x32xf32, #tpu.memory_space<vmem>>, %arg1: memref<320x136xf32, #tpu.memory_space<vmem>>, %arg2: memref<12x256xf32, #tpu.memory_space<vmem>>, %arg3: memref<8x2xf32, #tpu.memory_space<vmem>>) attributes {dimension_semantics = [], scalar_prefetch = 0 : i64, scratch_operands = 0 : i64, tpu.core_type = #tpu.core_type<tc>} {
    %c0 = arith.constant 0 : index
    %c0_0 = arith.constant 0 : index
    %0 = vector.load %arg0[%c0, %c0_0] : memref<8x32xf32, #tpu.memory_space<vmem>>, vector<8x32xf32>
    %c0_1 = arith.constant 0 : index
    %c0_2 = arith.constant 0 : index
    %1 = vector.load %arg1[%c0_1, %c0_2] : memref<320x136xf32, #tpu.memory_space<vmem>>, vector<32x136xf32>
    %cst = arith.constant dense<0.000000e+00> : vector<8x136xf32>
    %2 = tpu.matmul %0, %1, %cst {dimension_numbers = #tpu.dot_dimension_numbers<[1], [0], [0], [1], [0, 0, 1, 1], [], []>} : vector<8x32xf32>, vector<32x136xf32>, vector<8x136xf32> -> vector<8x136xf32>
    %c0_3 = arith.constant 0 : index
    %c0_4 = arith.constant 0 : index
    %3 = vector.load %arg2[%c0_3, %c0_4] : memref<12x256xf32, #tpu.memory_space<vmem>>, vector<1x136xf32>
    %4 = vector.broadcast %3 : vector<1x136xf32> to vector<8x136xf32>
    %5 = arith.addf %2, %4 : vector<8x136xf32>
    %6 = vector.extract_strided_slice %5 {offsets = [0, 0], sizes = [8, 128], strides = [1, 1]} : vector<8x136xf32> to vector<8x128xf32>
    %cst_5 = arith.constant 0.000000e+00 : f32
    %7 = vector.broadcast %cst_5 : f32 to vector<8x128xf32>
    %8 = arith.maximumf %6, %7 : vector<8x128xf32>
    %9 = vector.extract_strided_slice %5 {offsets = [0, 128], sizes = [8, 8], strides = [1, 1]} : vector<8x136xf32> to vector<8x8xf32>
    %c32 = arith.constant 32 : index
    %c0_6 = arith.constant 0 : index
    %10 = vector.load %arg1[%c32, %c0_6] : memref<320x136xf32, #tpu.memory_space<vmem>>, vector<128x128xf32>
    %cst_7 = arith.constant dense<0.000000e+00> : vector<8x128xf32>
    %11 = tpu.matmul %8, %10, %cst_7 {dimension_numbers = #tpu.dot_dimension_numbers<[1], [0], [0], [1], [0, 0, 1, 1], [], []>} : vector<8x128xf32>, vector<128x128xf32>, vector<8x128xf32> -> vector<8x128xf32>
    %c1 = arith.constant 1 : index
    %c0_8 = arith.constant 0 : index
    %12 = vector.load %arg2[%c1, %c0_8] : memref<12x256xf32, #tpu.memory_space<vmem>>, vector<1x128xf32>
    %13 = vector.broadcast %12 : vector<1x128xf32> to vector<8x128xf32>
    %14 = arith.addf %11, %13 : vector<8x128xf32>
    %cst_9 = arith.constant dense<0xFF800000> : vector<8xf32>
    %15 = vector.multi_reduction <maximumf>, %9, %cst_9 [1] : vector<8x8xf32> to vector<8xf32>
    %16 = vector.shape_cast %15 : vector<8xf32> to vector<8x1xf32>
    %17 = vector.broadcast %16 : vector<8x1xf32> to vector<8x8xf32>
    %18 = arith.subf %9, %17 : vector<8x8xf32>
    %19 = math.exp %18 : vector<8x8xf32>
    %c4 = arith.constant 4 : index
    %c0_10 = arith.constant 0 : index
    %20 = vector.load %arg2[%c4, %c0_10] : memref<12x256xf32, #tpu.memory_space<vmem>>, vector<8x256xf32>
    %cst_11 = arith.constant dense<0.000000e+00> : vector<8x256xf32>
    %21 = tpu.matmul %19, %20, %cst_11 {dimension_numbers = #tpu.dot_dimension_numbers<[1], [0], [0], [1], [0, 0, 1, 1], [], []>} : vector<8x8xf32>, vector<8x256xf32>, vector<8x256xf32> -> vector<8x256xf32>
    %22 = vector.extract_strided_slice %21 {offsets = [0, 0], sizes = [8, 128], strides = [1, 1]} : vector<8x256xf32> to vector<8x128xf32>
    %23 = vector.extract_strided_slice %21 {offsets = [0, 128], sizes = [8, 128], strides = [1, 1]} : vector<8x256xf32> to vector<8x128xf32>
    %24 = arith.divf %22, %23 : vector<8x128xf32>
    %25 = arith.mulf %24, %14 : vector<8x128xf32>
    %c160 = arith.constant 160 : index
    %c0_12 = arith.constant 0 : index
    %26 = vector.load %arg1[%c160, %c0_12] : memref<320x136xf32, #tpu.memory_space<vmem>>, vector<128x32xf32>
    %cst_13 = arith.constant dense<0.000000e+00> : vector<8x32xf32>
    %27 = tpu.matmul %25, %26, %cst_13 {dimension_numbers = #tpu.dot_dimension_numbers<[1], [0], [0], [1], [0, 0, 1, 1], [], []>} : vector<8x128xf32>, vector<128x32xf32>, vector<8x32xf32> -> vector<8x32xf32>
    %c2 = arith.constant 2 : index
    %c0_14 = arith.constant 0 : index
    %28 = vector.load %arg2[%c2, %c0_14] : memref<12x256xf32, #tpu.memory_space<vmem>>, vector<1x32xf32>
    %29 = vector.broadcast %28 : vector<1x32xf32> to vector<8x32xf32>
    %30 = arith.addf %27, %29 : vector<8x32xf32>
    %cst_15 = arith.constant 0.000000e+00 : f32
    %31 = vector.broadcast %cst_15 : f32 to vector<8x32xf32>
    %32 = arith.maximumf %30, %31 : vector<8x32xf32>
    %c288 = arith.constant 288 : index
    %c0_16 = arith.constant 0 : index
    %33 = vector.load %arg1[%c288, %c0_16] : memref<320x136xf32, #tpu.memory_space<vmem>>, vector<32x2xf32>
    %cst_17 = arith.constant dense<0.000000e+00> : vector<8x2xf32>
    %34 = tpu.matmul %32, %33, %cst_17 {dimension_numbers = #tpu.dot_dimension_numbers<[1], [0], [0], [1], [0, 0, 1, 1], [], []>} : vector<8x32xf32>, vector<32x2xf32>, vector<8x2xf32> -> vector<8x2xf32>
    %c3 = arith.constant 3 : index
    %c0_18 = arith.constant 0 : index
    %35 = vector.load %arg2[%c3, %c0_18] : memref<12x256xf32, #tpu.memory_space<vmem>>, vector<1x2xf32>
    %36 = vector.broadcast %35 : vector<1x2xf32> to vector<8x2xf32>
    %37 = arith.addf %34, %36 : vector<8x2xf32>
    %38 = arith.negf %37 : vector<8x2xf32>
    %39 = math.exp %38 : vector<8x2xf32>
    %cst_19 = arith.constant 1.000000e+00 : f32
    %40 = vector.broadcast %cst_19 : f32 to vector<8x2xf32>
    %41 = arith.addf %40, %39 : vector<8x2xf32>
    %42 = arith.divf %40, %41 : vector<8x2xf32>
    %c0_20 = arith.constant 0 : index
    %c0_21 = arith.constant 0 : index
    %43 = vector.load %arg3[%c0_20, %c0_21] : memref<8x2xf32, #tpu.memory_space<vmem>>, vector<8x2xf32>
    tpu.vector_store %arg3[%c0_20, %c0_21], %42 {strides = array<i32>} : memref<8x2xf32, #tpu.memory_space<vmem>>, vector<8x2xf32>,
    return
  }
}

</mosaic_0001>

<bundles_post_ra>
// kernel: tpu_custom_call.1
= control target key start
LH: loop header
LB: loop body
LE: loop exit
PB: predicated region body
PF: predicated region fallthrough
CT: control target
= control target key end

     0   :  { %v674_v3 = vmov 0.0   ;;  %v675_v4 = vmov 0.0|0.0   ;;  %vm35_vm0 = vcmask 261120   ;;  %vm676_vm1 = vmmov 0   ;;  %s889_s1 = inlined_call_operand.vmem [shape: f32[320,136], index: 1, kind: input, shape index: {}]   ;;  %s890_s0 = inlined_call_operand.vmem [shape: f32[8,32], index: 0, kind: input, shape index: {}]   ;;  %s891_s2 = inlined_call_operand.vmem [shape: f32[12,256], index: 2, kind: input, shape index: {}]   ;;  %s892_s3 = inlined_call_operand.vmem [shape: f32[8,2], index: 3, kind: output, shape index: {}]  }
   0x1   :  { %v16_v0 = vld [vmem:[%s889_s1 + $0x8] sm:$0xff]  ;;  %v18_v1 = vld [vmem:[%s889_s1 + $0x18] sm:$0xff]  ;;  %v15_v2 = vld [vmem:[%s889_s1] sm:$0xff]  ;;  %103 = vmatprep.mubr.f32.mxu0 %v674_v3  ;;  %609 = vmatprep.subr.bf16.mxu1 %v675_v4  ;;  %v25_v39 = vlaneseq  ;;  %vm198_vm2 = vcmask 64512   ;;  %vm213_vm3 = vcmask 1043456   ;;  %vm471_vm4 = vcmask 15360  }
   0x2   :  { %v601_v5 = vpack.c.bf16 %v18_v1, %v16_v0  ;;  %v17_v6 = vld [vmem:[%s889_s1 + $0x10] sm:$0xff]  ;;  %v20_v7 = vld [vmem:[%s889_s1 + $0x28] sm:$0xff]  ;;  %v22_v8 = vld [vmem:[%s889_s1 + $0x38] sm:$0xff]  ;;  %552 = vmatprep.mubr.msk.f32.mxu1 %vm676_vm1, %v674_v3 }
   0x3   :  { %v603_v9 = vpack.c.bf16 %v17_v6, %v15_v2  ;;  %v605_v10 = vpack.c.bf16 %v22_v8, %v20_v7  ;;  %v19_v11 = vld [vmem:[%s889_s1 + $0x20] sm:$0xff]  ;;  %v21_v12 = vld [vmem:[%s889_s1 + $0x30] sm:$0xff]  ;;  %v26_v40 = vshrl.u32 %v25_v39, 7  ;;  %v206_v52 = vld [vmem:[%s891_s2 + $0x8] sm:$0xf0] }
   0x4   :  { %602 = vmatprep.subr.bf16.mxu0 %v601_v5  ;;  %v111_v13 = vld [vmem:[%s889_s1 + $0x40] sm:$0xff]  ;;  %v112_v14 = vld [vmem:[%s889_s1 + $0x50] sm:$0xff]  ;;  %v607_v16 = vpack.c.bf16 %v21_v12, %v19_v11  ;;  %v208_v53 = vld [vmem:[%s891_s2 + $0x18] sm:$0xf]  ;;  %v217_v54 = vrot.slane %v206_v52, 4 }
   0x5   :  { %v113_v15 = vld [vmem:[%s889_s1 + $0x60] sm:$0xff]  ;;  %604 = vmatpush1.bf16.msra.mxu0 %v603_v9  ;;  %v610_v17 = vpack.c.bf16 %v112_v14, %v111_v13  ;;  %v114_v18 = vld [vmem:[%s889_s1 + $0x70] sm:$0xff]  ;;  %v27_v41 = vsub.s32 0, %v26_v40  ;;  %v31_v43 = vsub.s32 1, %v26_v40  ;;  %v218_v55 = vrot.slane %v208_v53, 4 }
   0x6   :  { %606 = vmatprep.subr.bf16.mxu0 %v605_v10  ;;  %v613_v19 = vpack.c.bf16 %v114_v18, %v113_v15  ;;  %v115_v20 = vld [vmem:[%s889_s1 + $0x80] sm:$0xff]  ;;  %v116_v21 = vld [vmem:[%s889_s1 + $0x90] sm:$0xff] }
   0x7   :  { %611 = vmatpush3.bf16.msra.mxu1 %v610_v17  ;;  %v14_v22 = vld [vmem:[%s890_s0] sm:$0xff]  ;;  %v616_v23 = vpack.c.bf16 %v116_v21, %v115_v20  ;;  %v118_v25 = vld [vmem:[%s889_s1 + $0xb0] sm:$0xff]  ;;  %v219_v60 = vsel %vm213_vm3, %v217_v54, %v218_v55 }
   0x8   :  { %612 = vmatprep.subr.bf16.mxu1 %v675_v4  ;;  %v117_v24 = vld [vmem:[%s889_s1 + $0xa0] sm:$0xff]  ;;  %v120_v28 = vld [vmem:[%s889_s1 + $0xd0] sm:$0xff] }
   0x9   :  { %608 = vmatpush1.bf16.msra.mxu0 %v607_v16  ;;  %v619_v26 = vpack.c.bf16 %v118_v25, %v117_v24  ;;  %v119_v27 = vld [vmem:[%s889_s1 + $0xc0] sm:$0xff]  ;;  %v122_v31 = vld [vmem:[%s889_s1 + $0xf0] sm:$0xff] }
   0xa   :  { %v622_v29 = vpack.c.bf16 %v120_v28, %v119_v27  ;;  %v121_v30 = vld [vmem:[%s889_s1 + $0xe0] sm:$0xff]  ;;  %v124_v34 = vld [vmem:[%s889_s1 + $0x110] sm:$0xff]  ;;  %225 = vmatprep.subr.mxu0 %v219_v60 }
   0xb   :  { %614 = vmatpush3.bf16.msra.mxu1 %v613_v19  ;;  %v625_v32 = vpack.c.bf16 %v122_v31, %v121_v30  ;;  %v123_v33 = vld [vmem:[%s889_s1 + $0x100] sm:$0xff]  ;;  %v126_v37 = vld [vmem:[%s889_s1 + $0x130] sm:$0xff] }
   0xc   :  { %477 = vmatmul.mubr.msk.f32.vlgmr.msra.gmra.mrb[0].mxu0 %vm35_vm0, %v14_v22  ;;  %615 = vmatprep.subr.bf16.mxu1 %v675_v4  ;;  %v628_v35 = vpack.c.bf16 %v124_v34, %v123_v33  ;;  %v125_v36 = vld [vmem:[%s889_s1 + $0x120] sm:$0xff]  ;;  %v207_v57 = vld [vmem:[%s891_s2 + $0x10] sm:$0xf] }
   0xd   :  { %289 = vmatprep.mubr.f32.mxu0 %v674_v3  ;;  %v631_v38 = vpack.c.bf16 %v126_v37, %v125_v36  ;;  %v23_v42 = vld [vmem:[%s891_s2] ss:$8 sm:$0x3]  ;;  %v205_v56 = vld [vmem:[%s891_s2] sm:$0xf0]  ;;  %v215_v59 = vrot.slane %v207_v57, 4 }
   0xe   :  { %v28_v44 = vrot.slane %v23_v42, %v27_v41  ;;  %v32_v45 = vrot.slane %v23_v42, %v31_v43  ;;  %v214_v58 = vrot.slane %v205_v56, 4  ;;  %v299_v1 = vld [vmem:[%s889_s1 + $0x140] sm:$0xff]  ;;  %v300_v2 = vld [vmem:[%s889_s1 + $0x150] sm:$0xff] }
   0xf   :  { %617 = vmatpush3.bf16.msra.mxu1 %v616_v23  ;;  %v634_v5 = vpack.c.bf16 %v300_v2, %v299_v1  ;;  %v301_v6 = vld [vmem:[%s889_s1 + $0x160] sm:$0xff]  ;;  %v302_v7 = vld [vmem:[%s889_s1 + $0x170] sm:$0xff] }
  0x10   :  { %618 = vmatprep.subr.bf16.mxu1 %v675_v4  ;;  %v216_v61 = vsel %vm213_vm3, %v214_v58, %v215_v59  ;;  %v637_v9 = vpack.c.bf16 %v302_v7, %v301_v6  ;;  %v303_v10 = vld [vmem:[%s889_s1 + $0x180] sm:$0xff]  ;;  %v304_v11 = vld [vmem:[%s889_s1 + $0x190] sm:$0xff] }
  0x11   :  { %226 = vmatpush1.msra.mxu0 %v216_v61  ;;  %v640_v12 = vpack.c.bf16 %v304_v11, %v303_v10  ;;  %v305_v13 = vld [vmem:[%s889_s1 + $0x1a0] sm:$0xff]  ;;  %v308_v18 = vld [vmem:[%s889_s1 + $0x1d0] sm:$0xff] }
  0x12   :  { %633 = vmatprep.subr.bf16.mxu0 %v675_v4  ;;  %v307_v17 = vld [vmem:[%s889_s1 + $0x1c0] sm:$0xff]  ;;  %v310_v21 = vld [vmem:[%s889_s1 + $0x1f0] sm:$0xff] }
  0x13   :  { %620 = vmatpush3.bf16.msra.mxu1 %v619_v26  ;;  %v646_v19 = vpack.c.bf16 %v308_v18, %v307_v17  ;;  %v309_v20 = vld [vmem:[%s889_s1 + $0x1e0] sm:$0xff]  ;;  %v312_v24 = vld [vmem:[%s889_s1 + $0x210] sm:$0xff] }
  0x14   :  { %621 = vmatprep.subr.bf16.mxu1 %v675_v4  ;;  %v649_v22 = vpack.c.bf16 %v310_v21, %v309_v20  ;;  %v311_v23 = vld [vmem:[%s889_s1 + $0x200] sm:$0xff]  ;;  %v314_v27 = vld [vmem:[%s889_s1 + $0x230] sm:$0xff] }
  0x15   :  { %v652_v25 = vpack.c.bf16 %v312_v24, %v311_v23  ;;  %v313_v26 = vld [vmem:[%s889_s1 + $0x220] sm:$0xff]  ;;  %v388_v30 = vld [vmem:[%s889_s1 + $0x250] sm:$0xff] }
  0x16   :  { %v655_v28 = vpack.c.bf16 %v314_v27, %v313_v26  ;;  %v127_v34 = vld [vmem:[%s891_s2 + $0x1] ss:$0 sm:$0xff]  ;;  %v315_v41 = vld [vmem:[%s891_s2 + $0x2] ss:$0 sm:$0xff] }
  0x17   :  { %623 = vmatpush3.bf16.msra.mxu1 %v622_v29  ;;  %v387_v29 = vld [vmem:[%s889_s1 + $0x240] sm:$0xff] }
  0x18   :  { %624 = vmatprep.subr.bf16.mxu1 %v675_v4  ;;  %v658_v31 = vpack.c.bf16 %v388_v30, %v387_v29  ;;  %v389_v39 = vld [vmem:[%s889_s1 + $0x260] sm:$0xff] }
  0x1b   :  { %626 = vmatpush3.bf16.msra.mxu1 %v625_v32 }
  0x1c   :  { %627 = vmatprep.subr.bf16.mxu1 %v675_v4 }
  0x1f   :  { %629 = vmatpush3.bf16.msra.mxu1 %v628_v35 }
  0x20   :  { %630 = vmatprep.subr.bf16.mxu1 %v675_v4 }
  0x23   :  { %632 = vmatpush3.bf16.msra.mxu1 %v631_v38 }
  0x24   :  { %657 = vmatprep.subr.bf16.mxu1 %v675_v4 }
  0xdf   :  { %v105_v46 = vpop.f32.mrb[0].mxu0 }
  0xe0   :  { %v106_v47 = vadd.f32 %v105_v46, %v28_v44  ;;  %v107_v48 = vpop.f32.mrb[1].mxu0  ;;  %v391_v46 = vld [vmem:[%s891_s2 + $0x3] ss:$0 sm:$0xff] }
  0xe1   :  { %v108_v49 = vadd.f32 %v107_v48, %v32_v45 }
  0xe2   :  { %v110_v50 = vmax.f32 %v106_v47, 0.0 }
  0xe3   :  { %v199_v51 = vsel %vm198_vm2, %v108_v49, -inf }
  0xe4   :  { %553 = vmatmul.mubr.f32.vlgmr.msra.gmra.mrb[0].mxu1 %v110_v50  ;;  %200 = vmax.xlane.f32.xlu0 %v199_v51 }
  0xe5   :  { %598 = vmatprep.mubr.msk.f32.mxu1 %vm676_vm1, %v674_v3  ;;  %659 = vmatpush3.bf16.msra.mxu1 %v658_v31 }
  0xe6   :  { %660 = vmatprep.subr.bf16.mxu1 %v675_v4 }
 0x171   :  { %v201_v62 = vpop.xlane.xlu0 %200 }
 0x172   :  { %v202_v63 = vsub.f32 %v108_v49, %v201_v62 }
 0x174   :  { %v203_v0 = vmul.f32 1.442695, %v202_v63 }
 0x176   :  { %666 = vpow2.f32 %v203_v0 }
 0x180   :  { %v667_v8 = vpop.eup %666 }
 0x181   :  { %478 = vmatmul.mubr.msk.f32.vlgmr.msra.gmra.mrb[2].mxu0 %vm198_vm2, %v667_v8 }
 0x182   :  { %635 = vmatpush3.bf16.msra.mxu0 %v634_v5  ;;  %587 = vmatprep.mubr.msk.f32.mxu0 %vm676_vm1, %v674_v3  ;;  %v306_v3 = vld [vmem:[%s889_s1 + $0x1b0] sm:$0xff] }
 0x183   :  { %636 = vmatprep.subr.bf16.mxu0 %v675_v4  ;;  %v643_v14 = vpack.c.bf16 %v306_v3, %v305_v13 }
 0x186   :  { %638 = vmatpush3.bf16.msra.mxu0 %v637_v9 }
 0x187   :  { %639 = vmatprep.subr.bf16.mxu0 %v675_v4 }
 0x18a   :  { %641 = vmatpush3.bf16.msra.mxu0 %v640_v12 }
 0x18b   :  { %642 = vmatprep.subr.bf16.mxu0 %v675_v4 }
 0x18e   :  { %644 = vmatpush3.bf16.msra.mxu0 %v643_v14 }
 0x18f   :  { %645 = vmatprep.subr.bf16.mxu0 %v675_v4 }
 0x192   :  { %647 = vmatpush3.bf16.msra.mxu0 %v646_v19 }
 0x193   :  { %648 = vmatprep.subr.bf16.mxu0 %v675_v4 }
 0x196   :  { %650 = vmatpush3.bf16.msra.mxu0 %v649_v22 }
 0x197   :  { %651 = vmatprep.subr.bf16.mxu0 %v675_v4 }
 0x19a   :  { %653 = vmatpush3.bf16.msra.mxu0 %v652_v25 }
 0x19b   :  { %654 = vmatprep.subr.bf16.mxu0 %v675_v4  ;;  %v390_v4 = vld [vmem:[%s889_s1 + $0x270] sm:$0xff] }
 0x19c   :  { %v661_v40 = vpack.c.bf16 %v390_v4, %v389_v39 }
 0x19e   :  { %656 = vmatpush3.bf16.msra.mxu0 %v655_v28  ;;  %662 = vmatpush3.bf16.msra.mxu1 %v661_v40 }
 0x1b7   :  { %v194_v15 = vpop.f32.mrb[0].mxu1 }
 0x1b8   :  { %v554_v16 = vpop.f32.mrb[1].mxu1  ;;  %v195_v36 = vadd.f32 %v194_v15, %v127_v34 }
 0x254   :  { %v291_v32 = vpop.f32.mrb[2].mxu0 }
 0x255   :  { %v293_v33 = vpop.f32.mrb[3].mxu0 }
 0x256   :  { %668 = vrcp.f32 %v293_v33 }
 0x260   :  { %v669_v35 = vpop.eup %668 }
 0x261   :  { %v297_v37 = vmul.f32 %v669_v35, %v291_v32 }
 0x263   :  { %v298_v38 = vmul.f32 %v297_v37, %v195_v36 }
 0x265   :  { %588 = vmatmul.mubr.f32.vlgmr.msra.gmra.mrb[4].mxu0 %v298_v38 }
 0x338   :  { %v382_v42 = vpop.f32.mrb[4].mxu0 }
 0x339   :  { %v383_v43 = vadd.f32 %v382_v42, %v315_v41  ;;  %v589_v44 = vpop.f32.mrb[5].mxu0 }
 0x33b   :  { %v386_v45 = vmax.f32 %v383_v43, 0.0 }
 0x33d   :  { %599 = vmatmul.mubr.msk.f32.vlgmr.msra.gmra.mrb[2].mxu1 %vm35_vm0, %v386_v45 }
 0x410   :  { %v461_v47 = vpop.f32.mrb[2].mxu1 }
 0x411   :  { %v462_v48 = vadd.f32 %v461_v47, %v391_v46  ;;  %v600_v49 = vpop.f32.mrb[3].mxu1 }
 0x413   :  { %v480_v50 = vmul.f32 -1.442695, %v462_v48 }
 0x415   :  { %670 = vpow2.f32 %v480_v50 }
 0x41f   :  { %v671_v51 = vpop.eup %670 }
 0x420   :  { %v468_v52 = vadd.f32 1.0, %v671_v51 }
 0x422   :  { %672 = vrcp.f32 %v468_v52 }
 0x42c   :  { %v673_v53 = vpop.eup %672 }
 0x42d   :  { %472 = vst.msk [vmem:[%s892_s3] sm:$0xff] %vm471_vm4, %v673_v53 }

</bundles_post_ra>
